<compile_context>
chip_gen: v7x
topology: tpu7x:2x2x1
jax: 0.10.0
libtpu: 0.0.40
codegen_flags: <defaults>
</compile_context>

<pallas_src>
import functools

import jax
import jax.numpy as jnp
from jax.experimental import pallas as pl
from jax.experimental.pallas import tpu as pltpu

MIN_VALUE = 0.9   # torch.clamp_min bound
MAX_VALUE = 0.0   # torch.clamp_max bound
IMG_CHUNK = 4     # images processed per in-kernel chunk (bounds vreg live-set)


def _conv1x1_pad_clamp_kernel(H, W, single_store, w_ref, b_ref, x_ref, o_ref):
    """One grid step == one block of `nb` images.

    w_ref: SMEM (C,)                 conv weight (out_channels == 1)
    b_ref: SMEM (1,)                 conv bias
    x_ref: VMEM (nb, C, H, W)        un-padded input block
    o_ref: VMEM (nb, 1, H+2, W+2)    padded output block
    """
    nb = x_ref.shape[0]
    C = x_ref.shape[1]
    Hp, Wp = H + 2, W + 2

    # Hoist the SMEM scalar reads once per block.
    w = [w_ref[c] for c in range(C)]
    b = b_ref[0]
    # padding=1 with a 1x1 kernel: border pixels see only zero-padded input,
    # so their value is clamp(bias).
    border = jnp.minimum(jnp.maximum(b, MIN_VALUE), MAX_VALUE)

    # Process the block in small image chunks so the per-chunk live set
    # (channel slice + accumulator + padded tile) stays far below 64 vregs.
    for i0 in range(0, nb, IMG_CHUNK):
        m = min(IMG_CHUNK, nb - i0)

        # Channel reduction: read one channel slice at a time from the ref
        # (no whole-block materialization), pure VPU FMAs (no MXU).
        acc = x_ref[i0:i0 + m, 0:1, :, :] * w[0]            # (m, 1, H, W)
        for c in range(1, C):
            acc = acc + x_ref[i0:i0 + m, c:c + 1, :, :] * w[c]
        acc = jnp.minimum(jnp.maximum(acc + b, MIN_VALUE), MAX_VALUE)

        if single_store:
            # Build the padded tile in-register and issue ONE full-tile store.
            col = jnp.full((m, 1, H, 1), border, dtype=acc.dtype)
            wide = jnp.concatenate([col, acc, col], axis=3)          # (m,1,H,Wp)
            row = jnp.full((m, 1, 1, Wp), border, dtype=acc.dtype)
            padded = jnp.concatenate([row, wide, row], axis=2)       # (m,1,Hp,Wp)
            o_ref[i0:i0 + m] = padded.astype(o_ref.dtype)
        else:
            # Fallback (previously-validated op set): constant fill + interior
            # overwrite.  Only used if the concatenate above fails to lower.
            o_ref[i0:i0 + m] = jnp.full((m, 1, Hp, Wp), border, dtype=o_ref.dtype)
            o_ref[i0:i0 + m, :, 1:H + 1, 1:W + 1] = acc.astype(o_ref.dtype)


def conv1x1_pad_clamp(x, weight, bias, *, max_block_n=32):
    """x: (N, C, H, W) f32; weight: (1, C, 1, 1); bias: (1,).

    Equivalent to torch:
        clamp_max(clamp_min(Conv2d(C, 1, 1, padding=1)(x), 0.9), 0.0)
    Output shape: (N, 1, H + 2, W + 2).
    """
    N, C, H, W = x.shape
    Hp, Wp = H + 2, W + 2

    w_flat = weight.reshape(C).astype(jnp.float32)    # (C,)
    b_flat = bias.reshape(1).astype(jnp.float32)      # (1,)

    # Batch-block selection:
    #  * grid = cdiv(N, nb): no silent degradation to nb=1 for prime N (the
    #    trailing partial block is handled by Pallas block masking).
    #  * N > 1: cap nb at cdiv(N, 2) so there are always >= 2 grid steps and
    #    the "parallel" batch axis can shard across both v7x TensorCores.
    #  * max_block_n images/step amortizes per-step (~0.35 us) overhead; VMEM
    #    footprint stays tiny (nb * ~15 KiB double-buffered).
    if N <= 1:
        nb = 1
    else:
        nb = max(1, min(max_block_n, pl.cdiv(N, 2)))
    grid = (pl.cdiv(N, nb),)

    def build(single_store):
        kernel = functools.partial(_conv1x1_pad_clamp_kernel, H, W, single_store)
        grid_spec = pltpu.PrefetchScalarGridSpec(
            num_scalar_prefetch=2,
            grid=grid,
            in_specs=[
                pl.BlockSpec((nb, C, H, W), lambda n, w, b: (n, 0, 0, 0)),
            ],
            out_specs=pl.BlockSpec((nb, 1, Hp, Wp), lambda n, w, b: (n, 0, 0, 0)),
        )
        return pl.pallas_call(
            kernel,
            out_shape=jax.ShapeDtypeStruct((N, 1, Hp, Wp), jnp.float32),
            grid_spec=grid_spec,
            compiler_params=pltpu.CompilerParams(
                dimension_semantics=("parallel",)),
        )

    try:
        out = build(single_store=True)(w_flat, b_flat, x)
        return jax.block_until_ready(out)
    except Exception:
        # Unaligned minor-dim concatenate not supported by this toolchain:
        # fall back to the previously-validated two-store kernel.
        out = build(single_store=False)(w_flat, b_flat, x)
        return jax.block_until_ready(out)


if __name__ == "__main__":
    key = jax.random.PRNGKey(0)
    kx, kw, kb = jax.random.split(key, 3)

    # Input matching the PyTorch example: x1 = torch.randn(1, 3, 30, 30)
    x1 = jax.random.normal(kx, (1, 3, 30, 30), dtype=jnp.float32)

    # Deterministic Conv2d(3, 1, 1) parameters (kaiming-uniform-ish range).
    fan_in = 3 * 1 * 1
    bound = 1.0 / (fan_in ** 0.5)
    weight = jax.random.uniform(kw, (1, 3, 1, 1), jnp.float32, -bound, bound)
    bias = jax.random.uniform(kb, (1,), jnp.float32, -bound, bound)

    out = conv1x1_pad_clamp(x1, weight, bias)
    out = jax.block_until_ready(out)

    # Reference check in plain JAX (pad -> 1x1 conv -> clamp_min -> clamp_max).
    xp = jnp.pad(x1, ((0, 0), (0, 0), (1, 1), (1, 1)))
    ref = jnp.einsum("nchw,oc->nohw", xp, weight.reshape(1, 3)) + bias.reshape(1, 1, 1, 1)
    ref = jnp.minimum(jnp.maximum(ref, MIN_VALUE), MAX_VALUE)

    assert out.shape == (1, 1, 32, 32), out.shape
    assert jnp.allclose(out, ref, atol=1e-5), "mismatch vs reference"

    print("KERNEL_OK")
</pallas_src>

<mosaic_0001>
module attributes {stable_mosaic.version = 11 : i64} {
  func.func @_conv1x1_pad_clamp_kernel(%arg0: i32, %arg1: memref<3xf32, #tpu.memory_space<smem>>, %arg2: memref<1xf32, #tpu.memory_space<smem>>, %arg3: memref<1x3x30x30xf32, #tpu.memory_space<vmem>>, %arg4: memref<1x1x32x32xf32, #tpu.memory_space<vmem>>) attributes {dimension_semantics = [#tpu.dimension_semantics<parallel>], iteration_bounds = array<i64: 1>, scalar_prefetch = 2 : i64, scratch_operands = 0 : i64, tpu.core_type = #tpu.core_type<tc>, window_params = [{transform_indices = @transform_0, window_bounds = array<i64: 1, 3, 30, 30>}, {transform_indices = @transform_1, window_bounds = array<i64: 1, 1, 32, 32>}]} {
    %c0 = arith.constant 0 : index
    %0 = memref.load %arg1[%c0] : memref<3xf32, #tpu.memory_space<smem>>
    %c1 = arith.constant 1 : index
    %1 = memref.load %arg1[%c1] : memref<3xf32, #tpu.memory_space<smem>>
    %c2 = arith.constant 2 : index
    %2 = memref.load %arg1[%c2] : memref<3xf32, #tpu.memory_space<smem>>
    %c0_0 = arith.constant 0 : index
    %3 = memref.load %arg2[%c0_0] : memref<1xf32, #tpu.memory_space<smem>>
    %cst = arith.constant 0.899999976 : f32
    %4 = arith.maximumf %3, %cst : f32
    %cst_1 = arith.constant 0.000000e+00 : f32
    %5 = arith.minimumf %4, %cst_1 : f32
    %c0_2 = arith.constant 0 : index
    %c0_3 = arith.constant 0 : index
    %c0_4 = arith.constant 0 : index
    %c0_5 = arith.constant 0 : index
    %6 = vector.load %arg3[%c0_2, %c0_3, %c0_4, %c0_5] : memref<1x3x30x30xf32, #tpu.memory_space<vmem>>, vector<1x1x30x30xf32>
    %7 = vector.broadcast %0 : f32 to vector<1x1x30x30xf32>
    %8 = arith.mulf %6, %7 : vector<1x1x30x30xf32>
    %c0_6 = arith.constant 0 : index
    %c1_7 = arith.constant 1 : index
    %c0_8 = arith.constant 0 : index
    %c0_9 = arith.constant 0 : index
    %9 = vector.load %arg3[%c0_6, %c1_7, %c0_8, %c0_9] : memref<1x3x30x30xf32, #tpu.memory_space<vmem>>, vector<1x1x30x30xf32>
    %10 = vector.broadcast %1 : f32 to vector<1x1x30x30xf32>
    %11 = arith.mulf %9, %10 : vector<1x1x30x30xf32>
    %12 = arith.addf %8, %11 : vector<1x1x30x30xf32>
    %c0_10 = arith.constant 0 : index
    %c2_11 = arith.constant 2 : index
    %c0_12 = arith.constant 0 : index
    %c0_13 = arith.constant 0 : index
    %13 = vector.load %arg3[%c0_10, %c2_11, %c0_12, %c0_13] : memref<1x3x30x30xf32, #tpu.memory_space<vmem>>, vector<1x1x30x30xf32>
    %14 = vector.broadcast %2 : f32 to vector<1x1x30x30xf32>
    %15 = arith.mulf %13, %14 : vector<1x1x30x30xf32>
    %16 = arith.addf %12, %15 : vector<1x1x30x30xf32>
    %17 = vector.broadcast %3 : f32 to vector<1x1x30x30xf32>
    %18 = arith.addf %16, %17 : vector<1x1x30x30xf32>
    %cst_14 = arith.constant 0.899999976 : f32
    %19 = vector.broadcast %cst_14 : f32 to vector<1x1x30x30xf32>
    %20 = arith.maximumf %18, %19 : vector<1x1x30x30xf32>
    %cst_15 = arith.constant 0.000000e+00 : f32
    %21 = vector.broadcast %cst_15 : f32 to vector<1x1x30x30xf32>
    %22 = arith.minimumf %20, %21 : vector<1x1x30x30xf32>
    %23 = vector.broadcast %5 : f32 to vector<1x1x30x1xf32>
    %24 = tpu.concatenate %23, %22, %23 in 3 : vector<1x1x30x1xf32>, vector<1x1x30x30xf32>, vector<1x1x30x1xf32> -> vector<1x1x30x32xf32>
    %25 = vector.broadcast %5 : f32 to vector<1x1x1x32xf32>
    %26 = tpu.concatenate %25, %24, %25 in 2 : vector<1x1x1x32xf32>, vector<1x1x30x32xf32>, vector<1x1x1x32xf32> -> vector<1x1x32x32xf32>
    %c0_16 = arith.constant 0 : index
    %c0_17 = arith.constant 0 : index
    %c0_18 = arith.constant 0 : index
    %c0_19 = arith.constant 0 : index
    %27 = vector.load %arg4[%c0_16, %c0_17, %c0_18, %c0_19] : memref<1x1x32x32xf32, #tpu.memory_space<vmem>>, vector<1x1x32x32xf32>
    tpu.vector_store %arg4[%c0_16, %c0_17, %c0_18, %c0_19], %26 {strides = array<i32>} : memref<1x1x32x32xf32, #tpu.memory_space<vmem>>, vector<1x1x32x32xf32>,
    return
  }
  func.func @transform_0(%arg0: i32, %arg1: memref<3xf32, #tpu.memory_space<smem>>, %arg2: memref<1xf32, #tpu.memory_space<smem>>) -> (i32, i32, i32, i32) {
    %c0_i32 = arith.constant 0 : i32
    %c0_i32_0 = arith.constant 0 : i32
    %c0_i32_1 = arith.constant 0 : i32
    %c0_i32_2 = arith.constant 0 : i32
    return %arg0, %c0_i32, %c0_i32_0, %c0_i32_1 : i32, i32, i32, i32
  }
  func.func @transform_1(%arg0: i32, %arg1: memref<3xf32, #tpu.memory_space<smem>>, %arg2: memref<1xf32, #tpu.memory_space<smem>>) -> (i32, i32, i32, i32) {
    %c0_i32 = arith.constant 0 : i32
    %c0_i32_0 = arith.constant 0 : i32
    %c0_i32_1 = arith.constant 0 : i32
    %c0_i32_2 = arith.constant 0 : i32
    return %arg0, %c0_i32, %c0_i32_0, %c0_i32_1 : i32, i32, i32, i32
  }
}

module attributes {stable_mosaic.version = 11 : i64} {
  func.func @_conv1x1_pad_clamp_kernel(%arg0: i32, %arg1: memref<3xf32, #tpu.memory_space<smem>>, %arg2: memref<1xf32, #tpu.memory_space<smem>>, %arg3: memref<1x3x30x30xf32, #tpu.memory_space<vmem>>, %arg4: memref<1x1x32x32xf32, #tpu.memory_space<vmem>>) attributes {dimension_semantics = [#tpu.dimension_semantics<parallel>], iteration_bounds = array<i64: 1>, scalar_prefetch = 2 : i64, scratch_operands = 0 : i64, tpu.core_type = #tpu.core_type<tc>, window_params = [{transform_indices = @transform_0, window_bounds = array<i64: 1, 3, 30, 30>}, {transform_indices = @transform_1, window_bounds = array<i64: 1, 1, 32, 32>}]} {
    %c0 = arith.constant 0 : index
    %0 = memref.load %arg1[%c0] : memref<3xf32, #tpu.memory_space<smem>>
    %c1 = arith.constant 1 : index
    %1 = memref.load %arg1[%c1] : memref<3xf32, #tpu.memory_space<smem>>
    %c2 = arith.constant 2 : index
    %2 = memref.load %arg1[%c2] : memref<3xf32, #tpu.memory_space<smem>>
    %c0_0 = arith.constant 0 : index
    %3 = memref.load %arg2[%c0_0] : memref<1xf32, #tpu.memory_space<smem>>
    %cst = arith.constant 0.899999976 : f32
    %4 = arith.maximumf %3, %cst : f32
    %cst_1 = arith.constant 0.000000e+00 : f32
    %5 = arith.minimumf %4, %cst_1 : f32
    %c0_2 = arith.constant 0 : index
    %c0_3 = arith.constant 0 : index
    %c0_4 = arith.constant 0 : index
    %c0_5 = arith.constant 0 : index
    %6 = vector.load %arg3[%c0_2, %c0_3, %c0_4, %c0_5] : memref<1x3x30x30xf32, #tpu.memory_space<vmem>>, vector<1x1x30x30xf32>
    %7 = vector.broadcast %0 : f32 to vector<1x1x30x30xf32>
    %8 = arith.mulf %6, %7 : vector<1x1x30x30xf32>
    %c0_6 = arith.constant 0 : index
    %c1_7 = arith.constant 1 : index
    %c0_8 = arith.constant 0 : index
    %c0_9 = arith.constant 0 : index
    %9 = vector.load %arg3[%c0_6, %c1_7, %c0_8, %c0_9] : memref<1x3x30x30xf32, #tpu.memory_space<vmem>>, vector<1x1x30x30xf32>
    %10 = vector.broadcast %1 : f32 to vector<1x1x30x30xf32>
    %11 = arith.mulf %9, %10 : vector<1x1x30x30xf32>
    %12 = arith.addf %8, %11 : vector<1x1x30x30xf32>
    %c0_10 = arith.constant 0 : index
    %c2_11 = arith.constant 2 : index
    %c0_12 = arith.constant 0 : index
    %c0_13 = arith.constant 0 : index
    %13 = vector.load %arg3[%c0_10, %c2_11, %c0_12, %c0_13] : memref<1x3x30x30xf32, #tpu.memory_space<vmem>>, vector<1x1x30x30xf32>
    %14 = vector.broadcast %2 : f32 to vector<1x1x30x30xf32>
    %15 = arith.mulf %13, %14 : vector<1x1x30x30xf32>
    %16 = arith.addf %12, %15 : vector<1x1x30x30xf32>
    %17 = vector.broadcast %3 : f32 to vector<1x1x30x30xf32>
    %18 = arith.addf %16, %17 : vector<1x1x30x30xf32>
    %cst_14 = arith.constant 0.899999976 : f32
    %19 = vector.broadcast %cst_14 : f32 to vector<1x1x30x30xf32>
    %20 = arith.maximumf %18, %19 : vector<1x1x30x30xf32>
    %cst_15 = arith.constant 0.000000e+00 : f32
    %21 = vector.broadcast %cst_15 : f32 to vector<1x1x30x30xf32>
    %22 = arith.minimumf %20, %21 : vector<1x1x30x30xf32>
    %23 = vector.broadcast %5 : f32 to vector<1x1x32x32xf32>
    %c0_16 = arith.constant 0 : index
    %c0_17 = arith.constant 0 : index
    %c0_18 = arith.constant 0 : index
    %c0_19 = arith.constant 0 : index
    %24 = vector.load %arg4[%c0_16, %c0_17, %c0_18, %c0_19] : memref<1x1x32x32xf32, #tpu.memory_space<vmem>>, vector<1x1x32x32xf32>
    tpu.vector_store %arg4[%c0_16, %c0_17, %c0_18, %c0_19], %23 {strides = array<i32>} : memref<1x1x32x32xf32, #tpu.memory_space<vmem>>, vector<1x1x32x32xf32>,
    %c0_20 = arith.constant 0 : index
    %c0_21 = arith.constant 0 : index
    %c1_22 = arith.constant 1 : index
    %c1_23 = arith.constant 1 : index
    %25 = vector.load %arg4[%c0_20, %c0_21, %c1_22, %c1_23] : memref<1x1x32x32xf32, #tpu.memory_space<vmem>>, vector<1x1x30x30xf32>
    tpu.vector_store %arg4[%c0_20, %c0_21, %c1_22, %c1_23], %22 {strides = array<i32>} : memref<1x1x32x32xf32, #tpu.memory_space<vmem>>, vector<1x1x30x30xf32>,
    return
  }
  func.func @transform_0(%arg0: i32, %arg1: memref<3xf32, #tpu.memory_space<smem>>, %arg2: memref<1xf32, #tpu.memory_space<smem>>) -> (i32, i32, i32, i32) {
    %c0_i32 = arith.constant 0 : i32
    %c0_i32_0 = arith.constant 0 : i32
    %c0_i32_1 = arith.constant 0 : i32
    %c0_i32_2 = arith.constant 0 : i32
    return %arg0, %c0_i32, %c0_i32_0, %c0_i32_1 : i32, i32, i32, i32
  }
  func.func @transform_1(%arg0: i32, %arg1: memref<3xf32, #tpu.memory_space<smem>>, %arg2: memref<1xf32, #tpu.memory_space<smem>>) -> (i32, i32, i32, i32) {
    %c0_i32 = arith.constant 0 : i32
    %c0_i32_0 = arith.constant 0 : i32
    %c0_i32_1 = arith.constant 0 : i32
    %c0_i32_2 = arith.constant 0 : i32
    return %arg0, %c0_i32, %c0_i32_0, %c0_i32_1 : i32, i32, i32, i32
  }
}

</mosaic_0001>

<bundles_post_ra>
// kernel: tpu_custom_call.1
= control target key start
LH: loop header
LB: loop body
LE: loop exit
PB: predicated region body
PF: predicated region fallthrough
CT: control target
= control target key end

     0   :  { %s296_s0 = inlined_call_operand.vmem [shape: f32[3], index: 0, kind: input, shape index: {}]   ;;  %s297_s1 = inlined_call_operand.<no memory space> [shape: f32[1], index: 1, kind: input, shape index: {}]   ;;  %s298_s2 = inlined_call_operand.vmem [shape: f32[1,3,30,30], index: 2, kind: input, shape index: {}]   ;;  %s299_s3 = inlined_call_operand.hbm [shape: f32[1,1,32,32], index: 3, kind: output, shape index: {}]  }
   0x1   :  { %s8_s14 = sshll.u32 %s296_s0, 4  ;;  %s9_s14 = int_to_ptr.vmem [resolvable:$true] %s8_s14 }
   0x2   :  { %s158_s15 = scalar_lea.vmem %s9_s14, 16  ;;  %p163_p1 = scmp.lt.s32.totalorder %s9_s14, %s9_s14 }
   0x3   :  { %p159_p0 = scmp.ne.s32.totalorder %s9_s14, %s158_s15  ;;  %p164_p2 = scmp.lt.s32.totalorder %s158_s15, %s158_s15 }
   0x5   :  { %p165_p3 = por %p164_p2, %p163_p1 }
   0x7   :  { %p166_p4 = pnand %p165_p3, %p159_p0 }
   0x9   :  { %169 = shalt.err (!%p166_p4)  }
   0xa   :  { %s196_s16 = smov [#allocation3]  }
   0xb   :  { %11 = dma.vmem_to_smem %s9_s14, 16, %s196_s16, [#allocation2] }
   0xc   :  { %192 = dma.done.wait [#allocation2], 16 }
   0xd   :  { %193 = vsyncadd [#allocation2], 4294967280 }
   0xe   :  { %14 = sfence }
   0xf   :  { %s18_s17 = sld [smem:[#allocation3]]  ;;  %s141_s18 = sld [smem:[#allocation3 + $0x1]]  ;;  %v26_v0 = vld [vmem:[%s298_s2 + $0x10] sm:$0xff]  ;;  %v24_v3 = vld [vmem:[%s298_s2] sm:$0xff] }
  0x10   :  { %s142_s19 = sld [smem:[#allocation3 + $0x2]]  ;;  %v145_v1 = vld [vmem:[%s298_s2 + $0x30] sm:$0xff]  ;;  %v143_v4 = vld [vmem:[%s298_s2 + $0x20] sm:$0xff] }
  0x11   :  { %v149_v2 = vld [vmem:[%s298_s2 + $0x50] sm:$0xff] }
  0x12   :  { %15 = vsyncpa [#allocation6], 0  ;;  %v147_v5 = vld [vmem:[%s298_s2 + $0x40] sm:$0xff]  ;;  %v27_v6 = vld [vmem:[%s298_s2 + $0x18] sm:$0x3f]  ;;  %v61_v26 = vstv %s297_s1  ;;  %s199_s0 = smov 0.0  }
  0x13   :  { %v146_v7 = vld [vmem:[%s298_s2 + $0x38] sm:$0x3f]  ;;  %v25_v11 = vld [vmem:[%s298_s2 + $0x8] sm:$0xff]  ;;  %vm91_vm0 = vcmask 7168   ;;  %vm96_vm1 = vcmask 252928   ;;  %vm105_vm2 = vcmask 1040384  }
  0x14   :  { %v150_v10 = vld [vmem:[%s298_s2 + $0x58] sm:$0x3f]  ;;  %v144_v16 = vld [vmem:[%s298_s2 + $0x28] sm:$0xff]  ;;  %vm120_vm3 = vcmask 261120   ;;  %vm118_vm4 = vcmask 1046528  }
  0x15   :  { %v28_v8 = vstv %s18_s17  ;;  %v38_v9 = vstv %s141_s18  ;;  %v148_v17 = vld [vmem:[%s298_s2 + $0x48] sm:$0xff]  ;;  %s197_s2 = smov 1   ;;  %s198_s18 = smov 0.9  }
  0x16   :  { %v31_v12 = vmul.f32 %v28_v8, %v26_v0  ;;  %v41_v13 = vmul.f32 %v145_v1, %v38_v9  ;;  %v52_v14 = vstv %s142_s19  ;;  %v29_v15 = vmul.f32 %v28_v8, %v24_v3  ;;  %s22_s21 = smax.f32 %s198_s18, %s297_s1  ;;  %s200_s1 = smov [#allocation5]  }
  0x17   :  { %v55_v18 = vmul.f32 %v149_v2, %v52_v14  ;;  %v39_v19 = vmul.f32 %v143_v4, %v38_v9  ;;  %v53_v20 = vmul.f32 %v147_v5, %v52_v14  ;;  %v32_v21 = vmul.f32 %v28_v8, %v27_v6  ;;  %s23_s22 = smin.f32 %s199_s0, %s22_s21  ;;  %s130_s23 = sshll.u32 %s200_s1, 4  ;;  %s131_s23 = int_to_ptr.vmem [resolvable:$true] %s130_s23 }
  0x18   :  { %v45_v22 = vadd.f32 %v41_v13, %v31_v12  ;;  %v42_v23 = vmul.f32 %v146_v7, %v38_v9  ;;  %v56_v24 = vmul.f32 %v150_v10, %v52_v14  ;;  %v30_v25 = vmul.f32 %v28_v8, %v25_v11  ;;  %s170_s24 = scalar_lea.vmem %s131_s23, 512  ;;  %p175_p6 = scmp.lt.s32.totalorder %s131_s23, %s131_s23 }
  0x19   :  { %v43_v27 = vadd.f32 %v39_v19, %v29_v15  ;;  %v40_v28 = vmul.f32 %v144_v16, %v38_v9  ;;  %v54_v29 = vmul.f32 %v148_v17, %v52_v14  ;;  %v74_v48 = vstv %s23_s22  ;;  %p171_p5 = scmp.ne.s32.totalorder %s131_s23, %s170_s24  ;;  %p176_p7 = scmp.lt.s32.totalorder %s170_s24, %s170_s24 }
  0x1a   :  { %v59_v30 = vadd.f32 %v55_v18, %v45_v22  ;;  %v46_v31 = vadd.f32 %v42_v23, %v32_v21 }
  0x1b   :  { %v57_v32 = vadd.f32 %v53_v20, %v43_v27  ;;  %v44_v33 = vadd.f32 %v40_v28, %v30_v25  ;;  %p177_p8 = por %p176_p7, %p175_p6 }
  0x1c   :  { %v64_v34 = vadd.f32 %v61_v26, %v59_v30  ;;  %v60_v35 = vadd.f32 %v56_v24, %v46_v31 }
  0x1d   :  { %v62_v36 = vadd.f32 %v61_v26, %v57_v32  ;;  %v58_v37 = vadd.f32 %v54_v29, %v44_v33  ;;  %p178_p9 = pnand %p177_p8, %p171_p5 }
  0x1e   :  { %v68_v38 = vmax.f32 %v64_v34, 0.9  ;;  %v65_v39 = vadd.f32 %v61_v26, %v60_v35 }
  0x1f   :  { %v66_v40 = vmax.f32 %v62_v36, 0.9  ;;  %v63_v41 = vadd.f32 %v61_v26, %v58_v37 }
  0x20   :  { %v72_v42 = vmin.f32 %v68_v38, 0.0  ;;  %v69_v43 = vmax.f32 %v65_v39, 0.9 }
  0x21   :  { %v70_v44 = vmin.f32 %v66_v40, 0.0  ;;  %v67_v45 = vmax.f32 %v63_v41, 0.9 }
  0x22   :  { %83 = vrot.lane.b32.xlu0 %v72_v42, %s197_s2  ;;  %v73_v46 = vmin.f32 %v69_v43, 0.0 }
  0x23   :  { %79 = vrot.lane.b32.xlu1 %v70_v44, %s197_s2  ;;  %v71_v47 = vmin.f32 %v67_v45, 0.0 }
  0x26   :  { %85 = vrot.lane.b32.xlu0 %v73_v46, %s197_s2 }
  0x27   :  { %81 = vrot.lane.b32.xlu1 %v71_v47, %s197_s2 }
  0x94   :  { %v84_v49 = vpop.permute.xlu0 %83 }
  0x95   :  { %v94_v50 = vsel %vm91_vm0, %v74_v48, %v84_v49  ;;  %v80_v51 = vpop.permute.xlu1 %79 }
  0x96   :  { %v92_v52 = vsel %vm91_vm0, %v74_v48, %v80_v51  ;;  %v99_v54 = vsel %vm96_vm1, %v94_v50, %v74_v48 }
  0x97   :  { %v97_v53 = vsel %vm96_vm1, %v92_v52, %v74_v48  ;;  %v109_v62 = vrot.slane %v99_v54, 7 }
  0x98   :  { %v106_v55 = vrot.slane %v97_v53, 7  ;;  %v86_v56 = vpop.permute.xlu0 %85 }
  0x99   :  { %v95_v57 = vsel %vm91_vm0, %v74_v48, %v86_v56  ;;  %v82_v58 = vpop.permute.xlu1 %81 }
  0x9a   :  { %v117_v59 = vsel %vm105_vm2, %v74_v48, %v106_v55  ;;  %v100_v60 = vsel %vm96_vm1, %v95_v57, %v74_v48  ;;  %v93_v61 = vsel %vm91_vm0, %v74_v48, %v82_v58 }
  0x9b   :  { %121 = vst.msk [vmem:[#allocation5] sm:$0xff] %vm120_vm3, %v117_v59  ;;  %v111_v63 = vrot.slane %v100_v60, 7  ;;  %v98_v0 = vsel %vm96_vm1, %v93_v61, %v74_v48 }
  0x9c   :  { %v107_v1 = vrot.slane %v98_v0, 7 }
  0x9d   :  { %v112_v2 = vsel %vm105_vm2, %v109_v62, %v111_v63 }
  0x9e   :  { %v119_v3 = vsel %vm118_vm4, %v112_v2, %v74_v48  ;;  %v108_v4 = vsel %vm105_vm2, %v106_v55, %v107_v1  ;;  %v110_v5 = vsel %vm105_vm2, %v107_v1, %v109_v62 }
  0x9f   :  { %124 = vst.msk [vmem:[#allocation5 + $0x18] sm:$0xff] %vm120_vm3, %v119_v3  ;;  %122 = vst.msk [vmem:[#allocation5 + $0x8] sm:$0xff] %vm120_vm3, %v108_v4 }
  0xa0   :  { %123 = vst.msk [vmem:[#allocation5 + $0x10] sm:$0xff] %vm120_vm3, %v110_v5 }
  0xa1   :  { %181 = shalt.err (!%p178_p9)
}
  0xa2   :  { %s182_s27 = scalar_lea.hbm %s299_s3, 512 }
  0xa3   :  { %p183_p10 = scmp.ne.s32.totalorder %s299_s3, %s182_s27  ;;  %p186_p11 = scmp.lt.u32.totalorder %s182_s27, %s299_s3 }
  0xa5   :  { %p188_p12 = pnand %p186_p11, %p183_p10 }
  0xa7   :  { %191 = shalt.err (!%p188_p12)
}
  0xa8   :  { %s201_s5 = smov 128   ;;  %s202_s6 = smov 8  }
  0xa9   :  { %136 = dma.vmem_to_hbm [thread:$0]  %s131_s23, 512, %s299_s3, [#allocation6], %s201_s5, %s201_s5, %s202_s6  }
  0xaa   :  { %194 = dma.done.wait [#allocation6], 512  }
  0xab   :  { %195 = vsyncadd [#allocation6], 4294966784 }
  0xac   :  { %140 = vsyncpa [#allocation6], 1 }

// kernel: tpu_custom_call.1
= control target key start
LH: loop header
LB: loop body
LE: loop exit
PB: predicated region body
PF: predicated region fallthrough
CT: control target
= control target key end

     0   :  { %s261_s0 = inlined_call_operand.vmem [shape: f32[3], index: 0, kind: input, shape index: {}]   ;;  %s262_s1 = inlined_call_operand.<no memory space> [shape: f32[1], index: 1, kind: input, shape index: {}]   ;;  %s263_s2 = inlined_call_operand.vmem [shape: f32[1,3,30,30], index: 2, kind: input, shape index: {}]   ;;  %s264_s3 = inlined_call_operand.hbm [shape: f32[1,1,32,32], index: 3, kind: output, shape index: {}]  }
   0x1   :  { %s8_s14 = sshll.u32 %s261_s0, 4  ;;  %s9_s14 = int_to_ptr.vmem [resolvable:$true] %s8_s14 }
   0x2   :  { %s135_s15 = scalar_lea.vmem %s9_s14, 16  ;;  %p140_p1 = scmp.lt.s32.totalorder %s9_s14, %s9_s14 }
   0x3   :  { %p136_p0 = scmp.ne.s32.totalorder %s9_s14, %s135_s15  ;;  %p141_p2 = scmp.lt.s32.totalorder %s135_s15, %s135_s15 }
   0x5   :  { %p142_p3 = por %p141_p2, %p140_p1 }
   0x7   :  { %p143_p4 = pnand %p142_p3, %p136_p0 }
   0x9   :  { %146 = shalt.err (!%p143_p4)  }
   0xa   :  { %s173_s16 = smov [#allocation3]  }
   0xb   :  { %11 = dma.vmem_to_smem %s9_s14, 16, %s173_s16, [#allocation2] }
   0xc   :  { %169 = dma.done.wait [#allocation2], 16 }
   0xd   :  { %170 = vsyncadd [#allocation2], 4294967280 }
   0xe   :  { %14 = sfence }
   0xf   :  { %s18_s17 = sld [smem:[#allocation3]]  ;;  %s118_s18 = sld [smem:[#allocation3 + $0x1]]  ;;  %v26_v0 = vld [vmem:[%s263_s2 + $0x10] sm:$0xff]  ;;  %v24_v3 = vld [vmem:[%s263_s2] sm:$0xff]  ;;  %vm75_vm0 = vcmask 261120  }
  0x10   :  { %s119_s19 = sld [smem:[#allocation3 + $0x2]]  ;;  %v122_v1 = vld [vmem:[%s263_s2 + $0x30] sm:$0xff]  ;;  %v120_v4 = vld [vmem:[%s263_s2 + $0x20] sm:$0xff]  ;;  %s174_s4 = smov 0.9  }
  0x11   :  { %v126_v2 = vld [vmem:[%s263_s2 + $0x50] sm:$0xff]  ;;  %v124_v5 = vld [vmem:[%s263_s2 + $0x40] sm:$0xff]  ;;  %s22_s7 = smax.f32 %s174_s4, %s262_s1 }
  0x12   :  { %15 = vsyncpa [#allocation6], 0  ;;  %v27_v6 = vld [vmem:[%s263_s2 + $0x18] sm:$0x3f]  ;;  %s175_s14 = smov 0.0   ;;  %v25_v11 = vld [vmem:[%s263_s2 + $0x8] sm:$0xff]  ;;  %v61_v27 = vstv %s262_s1 }
  0x13   :  { %v123_v7 = vld [vmem:[%s263_s2 + $0x38] sm:$0x3f]  ;;  %s23_s15 = smin.f32 %s175_s14, %s22_s7  ;;  %v121_v17 = vld [vmem:[%s263_s2 + $0x28] sm:$0xff]  ;;  %s176_s1 = smov 1   ;;  %vm96_vm1 = vcmask 252936   ;;  %vm100_vm2 = vcmask 250888  }
  0x14   :  { %v127_v8 = vld [vmem:[%s263_s2 + $0x58] sm:$0x3f]  ;;  %v74_v12 = vstv %s23_s15  ;;  %v125_v18 = vld [vmem:[%s263_s2 + $0x48] sm:$0xff]  ;;  %s177_s2 = smov [#allocation5]  }
  0x15   :  { %v28_v9 = vstv %s18_s17  ;;  %v38_v10 = vstv %s118_s18  ;;  %78 = vst.msk [vmem:[#allocation5 + $0x10] sm:$0xff] %vm75_vm0, %v74_v12  ;;  %79 = vst.msk [vmem:[#allocation5 + $0x18] sm:$0xff] %vm75_vm0, %v74_v12 }
  0x16   :  { %v31_v13 = vmul.f32 %v28_v9, %v26_v0  ;;  %v41_v14 = vmul.f32 %v122_v1, %v38_v10  ;;  %v52_v15 = vstv %s119_s19  ;;  %v29_v16 = vmul.f32 %v28_v9, %v24_v3  ;;  %76 = vst.msk [vmem:[#allocation5] sm:$0xff] %vm75_vm0, %v74_v12  ;;  %77 = vst.msk [vmem:[#allocation5 + $0x8] sm:$0xff] %vm75_vm0, %v74_v12  ;;  %s107_s19 = sshll.u32 %s177_s2, 4  ;;  %s108_s19 = int_to_ptr.vmem [resolvable:$true] %s107_s19 }
  0x17   :  { %v55_v19 = vmul.f32 %v126_v2, %v52_v15  ;;  %v39_v20 = vmul.f32 %v120_v4, %v38_v10  ;;  %v53_v21 = vmul.f32 %v124_v5, %v52_v15  ;;  %v32_v22 = vmul.f32 %v28_v9, %v27_v6  ;;  %s147_s24 = scalar_lea.vmem %s108_s19, 512  ;;  %p152_p6 = scmp.lt.s32.totalorder %s108_s19, %s108_s19 }
  0x18   :  { %v45_v23 = vadd.f32 %v41_v14, %v31_v13  ;;  %v42_v24 = vmul.f32 %v123_v7, %v38_v10  ;;  %v56_v25 = vmul.f32 %v127_v8, %v52_v15  ;;  %v30_v26 = vmul.f32 %v28_v9, %v25_v11  ;;  %p148_p5 = scmp.ne.s32.totalorder %s108_s19, %s147_s24  ;;  %p153_p7 = scmp.lt.s32.totalorder %s147_s24, %s147_s24 }
  0x19   :  { %v43_v28 = vadd.f32 %v39_v20, %v29_v16  ;;  %v40_v29 = vmul.f32 %v121_v17, %v38_v10  ;;  %v54_v30 = vmul.f32 %v125_v18, %v52_v15 }
  0x1a   :  { %v59_v31 = vadd.f32 %v55_v19, %v45_v23  ;;  %v46_v32 = vadd.f32 %v42_v24, %v32_v22  ;;  %p154_p8 = por %p153_p7, %p152_p6 }
  0x1b   :  { %v57_v33 = vadd.f32 %v53_v21, %v43_v28  ;;  %v44_v34 = vadd.f32 %v40_v29, %v30_v26 }
  0x1c   :  { %v64_v35 = vadd.f32 %v61_v27, %v59_v31  ;;  %v60_v36 = vadd.f32 %v56_v25, %v46_v32  ;;  %p155_p9 = pnand %p154_p8, %p148_p5 }
  0x1d   :  { %v62_v37 = vadd.f32 %v61_v27, %v57_v33  ;;  %v58_v38 = vadd.f32 %v54_v30, %v44_v34 }
  0x1e   :  { %v68_v39 = vmax.f32 %v64_v35, 0.9  ;;  %v65_v40 = vadd.f32 %v61_v27, %v60_v36 }
  0x1f   :  { %v66_v41 = vmax.f32 %v62_v37, 0.9  ;;  %v63_v42 = vadd.f32 %v61_v27, %v58_v38 }
  0x20   :  { %v72_v43 = vmin.f32 %v68_v39, 0.0  ;;  %v69_v44 = vmax.f32 %v65_v40, 0.9 }
  0x21   :  { %v70_v45 = vmin.f32 %v66_v41, 0.0  ;;  %v67_v46 = vmax.f32 %v63_v42, 0.9 }
  0x22   :  { %88 = vrot.lane.b32.xlu1 %v72_v43, %s176_s1  ;;  %v73_v47 = vmin.f32 %v69_v44, 0.0 }
  0x23   :  { %84 = vrot.lane.b32.xlu0 %v70_v45, %s176_s1  ;;  %v71_v48 = vmin.f32 %v67_v46, 0.0 }
  0x26   :  { %90 = vrot.lane.b32.xlu1 %v73_v47, %s176_s1 }
  0x27   :  { %86 = vrot.lane.b32.xlu0 %v71_v48, %s176_s1 }
  0x94   :  { %v89_v49 = vpop.permute.xlu1 %88 }
  0x95   :  { %99 = vst.msk [vmem:[#allocation5 + $0x11] sm:$0xff] %vm96_vm1, %v89_v49  ;;  %v85_v50 = vpop.permute.xlu0 %84 }
  0x96   :  { %97 = vst.msk [vmem:[#allocation5 + $0x1] sm:$0xff] %vm96_vm1, %v85_v50 }
  0x98   :  { %v91_v51 = vpop.permute.xlu1 %90 }
  0x99   :  { %101 = vst.msk [vmem:[#allocation5 + $0x19] sm:$0x3f] %vm100_vm2, %v91_v51  ;;  %v87_v52 = vpop.permute.xlu0 %86 }
  0x9a   :  { %98 = vst.msk [vmem:[#allocation5 + $0x9] sm:$0xff] %vm96_vm1, %v87_v52 }
  0x9b   :  { %158 = shalt.err (!%p155_p9)
}
  0x9c   :  { %s159_s27 = scalar_lea.hbm %s264_s3, 512 }
  0x9d   :  { %p160_p10 = scmp.ne.s32.totalorder %s264_s3, %s159_s27  ;;  %p163_p11 = scmp.lt.u32.totalorder %s159_s27, %s264_s3 }
  0x9f   :  { %p165_p12 = pnand %p163_p11, %p160_p10 }
  0xa1   :  { %168 = shalt.err (!%p165_p12)
}
  0xa2   :  { %s178_s5 = smov 128   ;;  %s179_s6 = smov 8  }
  0xa3   :  { %113 = dma.vmem_to_hbm [thread:$0]  %s108_s19, 512, %s264_s3, [#allocation6], %s178_s5, %s178_s5, %s179_s6  }
  0xa4   :  { %171 = dma.done.wait [#allocation6], 512  }
  0xa5   :  { %172 = vsyncadd [#allocation6], 4294966784 }
  0xa6   :  { %117 = vsyncpa [#allocation6], 1 }

</bundles_post_ra>
